<compile_context>
chip_gen: v7x
topology: tpu7x:2x2x1
jax: 0.10.0
libtpu: 0.0.40
codegen_flags: <defaults>
</compile_context>

<pallas_src>
import functools

import jax
import jax.numpy as jnp
from jax.experimental import pallas as pl
from jax.experimental.pallas import tpu as pltpu


# ---------------------------------------------------------------------------
# Kernels
# ---------------------------------------------------------------------------

def _linear_kernel_single(x_ref, w_ref, b_ref, o_ref):
    """Single contraction block: x (TB, F), w (1, F) lane-dense, b (1,1) SMEM."""
    prod = x_ref[...] * w_ref[...]                                   # VPU
    s = jnp.sum(prod, axis=-1, keepdims=True, dtype=jnp.float32)     # XLU lane reduce
    o_ref[...] = (s + b_ref[0, 0]).astype(o_ref.dtype)


def _linear_kernel_acc(x_ref, w_ref, b_ref, o_ref, acc_ref, *, F, tk):
    """Multi-block contraction (K = grid axis 1) with f32 accumulator."""
    k = pl.program_id(1)

    @pl.when(k == 0)
    def _():
        acc_ref[...] = jnp.zeros_like(acc_ref)

    prod = x_ref[...] * w_ref[...]                                   # (TB, TK) VPU
    if F % tk != 0:
        # Mask the padded K tail (garbage lanes of the last partial block).
        col = jax.lax.broadcasted_iota(jnp.int32, prod.shape, 1)
        prod = jnp.where(k * tk + col < F, prod, 0.0)
    acc_ref[...] += jnp.sum(prod, axis=-1, keepdims=True, dtype=jnp.float32)

    @pl.when(k == pl.num_programs(1) - 1)
    def _():
        o_ref[...] = (acc_ref[...] + b_ref[0, 0]).astype(o_ref.dtype)


# ---------------------------------------------------------------------------
# Tiling policy
# ---------------------------------------------------------------------------

def _hw_budgets():
    """(x_tile_budget_bytes, vmem_limit_bytes), per TPU generation.

    Conservative default is safe on v7x (64 MiB VMEM per TC): 12 MiB x tiles,
    double-buffered ~24 MiB, limit 48 MiB.  On v5e/v6e (128 MiB physical VMEM)
    bump to 16 MiB tiles / 64 MiB limit.
    """
    x_budget = 12 * 1024 * 1024
    vmem_limit = 48 * 1024 * 1024
    try:
        if pltpu.get_tpu_info().vmem_capacity_bytes >= 96 * 1024 * 1024:
            x_budget = 16 * 1024 * 1024
            vmem_limit = 64 * 1024 * 1024
    except Exception:
        pass
    return x_budget, vmem_limit


def _choose_tiles(B, F, tb, tk, x_budget):
    """Pick (TB, TK) respecting the (8, 128) layout constraint and VMEM budget."""
    MAX_TK = 2048
    if tk is None:
        if F <= MAX_TK:
            tk = F
        else:
            # Prefer a 128-multiple divisor of F (no tail); otherwise MAX_TK
            # with in-kernel masking of the padded tail.
            tk = MAX_TK
            for cand in range(MAX_TK, 0, -128):
                if F % cand == 0:
                    tk = cand
                    break
    tk = min(tk, F)
    if tk < F and tk % 128 != 0:
        # Keep the layout legal for caller-supplied tk; tail is masked in-kernel.
        tk = min(F, ((tk + 127) // 128) * 128)

    if tb is None:
        tb = max(8, (x_budget // (tk * 4)) // 8 * 8)
        # Keep >= 2 batch blocks whenever possible so both v7x TensorCores get
        # work on the "parallel" batch axis (neutral on v5e/v6e).
        if B >= 16:
            tb = min(tb, max(8, (B // 2) // 8 * 8))
    tb = min(tb, B)
    if B > tb and tb % 8 != 0:
        tb = max(8, (tb // 8) * 8)
    return tb, tk


# ---------------------------------------------------------------------------
# Forward wrapper
# ---------------------------------------------------------------------------

def regularized_linear_regression_forward(x, weight, bias, *, tb=None, tk=None):
    """x: (B, F) f32, weight: (1, F) f32 (nn.Linear layout), bias: (1, 1) f32 -> (B, 1)."""
    B, F = x.shape
    assert weight.shape == (1, F) and bias.shape == (1, 1)

    x_budget, vmem_limit = _hw_budgets()
    tb, tk = _choose_tiles(B, F, tb, tk, x_budget)
    nb = pl.cdiv(B, tb)
    nk = pl.cdiv(F, tk)

    cost = pl.CostEstimate(
        flops=2 * B * F,
        transcendentals=0,
        bytes_accessed=4 * (B * F + F + B + 1),
    )

    if nk == 1:
        # Specialized single-K path: no accumulator scratch, no pl.when phases.
        return pl.pallas_call(
            _linear_kernel_single,
            out_shape=jax.ShapeDtypeStruct((B, 1), jnp.float32),
            grid=(nb,),
            in_specs=[
                pl.BlockSpec((tb, F), lambda i: (i, 0)),          # streamed x tiles
                pl.BlockSpec((1, F), lambda i: (0, 0)),           # resident lane-dense weight
                pl.BlockSpec(memory_space=pltpu.MemorySpace.SMEM),  # scalar bias
            ],
            out_specs=pl.BlockSpec((tb, 1), lambda i: (i, 0)),
            compiler_params=pltpu.CompilerParams(
                dimension_semantics=("parallel",),
                vmem_limit_bytes=vmem_limit,
            ),
            cost_estimate=cost,
        )(x, weight, bias)

    kernel = functools.partial(_linear_kernel_acc, F=F, tk=tk)
    return pl.pallas_call(
        kernel,
        out_shape=jax.ShapeDtypeStruct((B, 1), jnp.float32),
        grid=(nb, nk),
        in_specs=[
            pl.BlockSpec((tb, tk), lambda i, k: (i, k)),          # streamed x tiles
            pl.BlockSpec((1, tk), lambda i, k: (0, k)),           # lane-dense weight slice
            pl.BlockSpec(memory_space=pltpu.MemorySpace.SMEM),    # scalar bias
        ],
        out_specs=pl.BlockSpec((tb, 1), lambda i, k: (i, 0)),
        scratch_shapes=[pltpu.VMEM((tb, 1), jnp.float32)],
        compiler_params=pltpu.CompilerParams(
            dimension_semantics=("parallel", "arbitrary"),        # reduction axis last
            vmem_limit_bytes=vmem_limit,
        ),
        cost_estimate=cost,
    )(x, weight, bias)


# ---------------------------------------------------------------------------
# Parameter init + regularization loss (module parity; not kernel hot paths)
# ---------------------------------------------------------------------------

def init_params(key, in_features):
    """Mimic nn.Linear(in_features, 1) default init; weight kept as (1, F)."""
    kw, kb = jax.random.split(key)
    bound = 1.0 / jnp.sqrt(jnp.float32(in_features))
    weight = jax.random.uniform(
        kw, (1, in_features), dtype=jnp.float32, minval=-bound, maxval=bound
    )
    bias = jax.random.uniform(
        kb, (1, 1), dtype=jnp.float32, minval=-bound, maxval=bound
    )
    return weight, bias


def regularization_loss(weight, bias, l1_lambda=0.01, l2_lambda=0.01):
    # Tiny reduction over parameters; plain JAX (not worth a kernel).
    l1 = jnp.abs(weight).sum() + jnp.abs(bias).sum()
    l2 = (weight ** 2).sum() + (bias ** 2).sum()
    return l1_lambda * l1 + l2_lambda * l2


# ---------------------------------------------------------------------------
# Smoke tests
# ---------------------------------------------------------------------------

if __name__ == "__main__":
    key = jax.random.PRNGKey(0)
    k_x, k_x2, k_p, k_p2 = jax.random.split(key, 4)

    # Small shapes consistent with RegularizedLinearRegression(in_features).
    batch, in_features = 16, 32
    x = jax.random.normal(k_x, (batch, in_features), dtype=jnp.float32)
    weight, bias = init_params(k_p, in_features)
    ref = x @ weight.T + bias

    # 1) Auto-tiled path: single K block, >=2 batch blocks (v7x megacore-friendly).
    out = jax.block_until_ready(
        regularized_linear_regression_forward(x, weight, bias)
    )
    assert out.shape == (batch, 1)
    assert jnp.allclose(out, ref, atol=1e-5, rtol=1e-5)

    # 2) Multi-K accumulator path with a non-dividing K tail (masked in-kernel)
    #    and a partial last batch tile (B not a multiple of tb).
    batch2, feat2 = 20, 200
    x2 = jax.random.normal(k_x2, (batch2, feat2), dtype=jnp.float32)
    w2, b2 = init_params(k_p2, feat2)
    ref2 = x2 @ w2.T + b2
    out2 = jax.block_until_ready(
        regularized_linear_regression_forward(x2, w2, b2, tb=8, tk=128)
    )
    assert out2.shape == (batch2, 1)
    assert jnp.allclose(out2, ref2, atol=1e-4, rtol=1e-4)

    # Exercise the (non-kernel) regularization loss too.
    _ = jax.block_until_ready(regularization_loss(weight, bias))

    print("KERNEL_OK")
</pallas_src>

<mosaic_0001>
module attributes {stable_mosaic.version = 11 : i64} {
  func.func @_linear_kernel_single(%arg0: i32, %arg1: memref<8x32xf32, #tpu.memory_space<vmem>>, %arg2: memref<1x32xf32, #tpu.memory_space<vmem>>, %arg3: memref<1x1xf32, #tpu.memory_space<smem>>, %arg4: memref<8x1xf32, #tpu.memory_space<vmem>>) attributes {dimension_semantics = [#tpu.dimension_semantics<parallel>], iteration_bounds = array<i64: 2>, scalar_prefetch = 0 : i64, scratch_operands = 0 : i64, tpu.core_type = #tpu.core_type<tc>, window_params = [{transform_indices = @transform_0, window_bounds = array<i64: 8, 32>}, {pipeline_mode = #tpu.pipeline_mode<synchronous>, transform_indices = @transform_1, window_bounds = array<i64: 1, 32>}, {transform_indices = @transform_2, window_bounds = array<i64: 1, 1>}, {transform_indices = @transform_3, window_bounds = array<i64: 8, 1>}]} {
    %c0 = arith.constant 0 : index
    %c0_0 = arith.constant 0 : index
    %0 = vector.load %arg1[%c0, %c0_0] : memref<8x32xf32, #tpu.memory_space<vmem>>, vector<8x32xf32>
    %c0_1 = arith.constant 0 : index
    %c0_2 = arith.constant 0 : index
    %1 = vector.load %arg2[%c0_1, %c0_2] : memref<1x32xf32, #tpu.memory_space<vmem>>, vector<1x32xf32>
    %2 = vector.broadcast %1 : vector<1x32xf32> to vector<8x32xf32>
    %3 = arith.mulf %0, %2 : vector<8x32xf32>
    %cst = arith.constant dense<0.000000e+00> : vector<8xf32>
    %4 = vector.multi_reduction <add>, %3, %cst [1] : vector<8x32xf32> to vector<8xf32>
    %5 = vector.shape_cast %4 : vector<8xf32> to vector<8x1xf32>
    %c0_3 = arith.constant 0 : index
    %c0_4 = arith.constant 0 : index
    %6 = memref.load %arg3[%c0_3, %c0_4] : memref<1x1xf32, #tpu.memory_space<smem>>
    %7 = vector.broadcast %6 : f32 to vector<8x1xf32>
    %8 = arith.addf %5, %7 : vector<8x1xf32>
    %c0_5 = arith.constant 0 : index
    %c0_6 = arith.constant 0 : index
    %9 = vector.load %arg4[%c0_5, %c0_6] : memref<8x1xf32, #tpu.memory_space<vmem>>, vector<8x1xf32>
    tpu.vector_store %arg4[%c0_5, %c0_6], %8 {strides = array<i32>} : memref<8x1xf32, #tpu.memory_space<vmem>>, vector<8x1xf32>,
    return
  }
  func.func @transform_0(%arg0: i32) -> (i32, i32) {
    %c0_i32 = arith.constant 0 : i32
    %c0_i32_0 = arith.constant 0 : i32
    return %arg0, %c0_i32 : i32, i32
  }
  func.func @transform_1(%arg0: i32) -> (i32, i32) {
    %c0_i32 = arith.constant 0 : i32
    %c0_i32_0 = arith.constant 0 : i32
    %c0_i32_1 = arith.constant 0 : i32
    return %c0_i32, %c0_i32_0 : i32, i32
  }
  func.func @transform_2(%arg0: i32) -> (i32, i32) {
    %c0_i32 = arith.constant 0 : i32
    %c0_i32_0 = arith.constant 0 : i32
    %c0_i32_1 = arith.constant 0 : i32
    return %c0_i32, %c0_i32_0 : i32, i32
  }
  func.func @transform_3(%arg0: i32) -> (i32, i32) {
    %c0_i32 = arith.constant 0 : i32
    %c0_i32_0 = arith.constant 0 : i32
    return %arg0, %c0_i32 : i32, i32
  }
}

</mosaic_0001>

<bundles_post_ra>
// kernel: tpu_custom_call.1
= control target key start
LH: loop header
LB: loop body
LE: loop exit
PB: predicated region body
PF: predicated region fallthrough
CT: control target
= control target key end

     0   :  { %s520_s0 = inlined_call_operand.hbm [shape: f32[16,32], index: 0, kind: input, shape index: {}]   ;;  %s521_s1 = inlined_call_operand.vmem [shape: f32[1,32], index: 1, kind: input, shape index: {}]   ;;  %s522_s2 = inlined_call_operand.<no memory space> [shape: f32[1,1], index: 2, kind: input, shape index: {}]   ;;  %s523_s3 = inlined_call_operand.vmem [shape: f32[16,1], index: 3, kind: output, shape index: {}]  }
   0x1   :  { %8 = sst [smem:[#allocation2]] %s522_s2 }
   0x2   :  { %9 = vsyncpa [#allocation4], 0 }
   0x3   :  { %11 = vsyncpa [#allocation4 + $0x1], 0  ;;  %s410_s14 = smov 0   ;;  %s412_s15 = smov 0  }
   0x4   :  { %s414_s16 = smov 0   ;;  %s416_s17 = smov 0  }
   0x5 LB: > { %s429_s2 = sadd.s32 4294967295, %s384_s17   ;;  %s432_s18 = sadd.s32 1, %s384_s17   ;;  %s384_s17 = sphi %s416_s17, %s531_s17   ;;  %s380_s16 = sphi %s414_s16, %s530_s16   ;;  %s376_s15 = sphi %s412_s15, %s529_s15   ;;  %s372_s14 = sphi %s410_s14, %s528_s14  }
   0x6   : > { %s21_s19 = ssub.s32 %s384_s17, %s432_s18  ;;  %s24_s20 = sadd.s32 1, %s380_s16 }
   0x7   : > { %p22_p0 = scmp.eq.s32.totalorder %s21_s19, 0  ;;  %p31_p1 = scmp.ne.s32.totalorder %s380_s16, %s376_s15 }
   0x8   : > { %p32_p2 = scmp.eq.s32.totalorder %s384_s17, 0  ;;  %p37_p3 = scmp.ne.s32.totalorder %s376_s15, %s372_s14 }
   0x9   : > { %s442_s21 = scalar_select %p22_p0, %s380_s16, %s24_s20  }
   0xa   : > { %p33_p4 = por %p32_p2, %p31_p1  ;;  %p38_p5 = scmp.eq.s32.totalorder %s429_s2, 0 }
   0xb   : > { %p287_p6 = scmp.lt.s32.totalorder %s384_s17, 2  ;;  %s135_s23 = sand.u32 1, %s380_s16  }
   0xc   : > { %p446_p7 = por %p38_p5, %p37_p3  ;;  %s273_s24 = sshll.u32 %s135_s23, 3 }
   0xd   : > { %s274_s25 = sshll.u32 %s384_s17, 7  ;;  %s139_s29 = scalar_lea.vmem [#allocation3], %s273_s24 }
   0xe   : > { %s455_s28 = scalar_lea.hbm %s520_s0, %s274_s25  ;;  %s146_s30 = sshll.u32 %s139_s29, 4  ;;  %s457_s30 = int_to_ptr.vmem [resolvable:$true] %s146_s30 }
   0xf   : > { %p459_p8 = pnand %p287_p6, %p33_p4  ;;  %s136_s5 = scalar_lea.sflag [#allocation4], %s135_s23 }
  0x10   : > { %s320_s6 = scalar_lea.hbm %s455_s28, 128  ;;  %s325_s9 = scalar_lea.hbm %s520_s0, 256 }
  0x11   : > { %p321_p11 = scmp.ne.s32.totalorder %s455_s28, %s320_s6  ;;  %p322_p12 = pneg %p459_p8 }
  0x12   : > { %p326_p1 = scmp.lt.u32.totalorder %s455_s28, %s520_s0  ;;  %p327_p2 = scmp.lt.u32.totalorder %s325_s9, %s320_s6 }
  0x13   : > { %p323_p13 = pnand %p322_p12, %p321_p11  ;;  %p329_p4 = scmp.lt.u32.totalorder %s320_s6, %s455_s28 }
  0x14   : > { %p328_p3 = por %p327_p2, %p326_p1 }
  0x15   : > { %p324_p0 = pneg %p323_p13 }
  0x16   : > { %p330_p5 = por %p329_p4, %p328_p3 }
  0x18   : > { %p331_p6 = pnand %p330_p5, %p324_p0 }
  0x1a   : > { %334 = shalt.err (!%p331_p6)
}
  0x1b   : > { %s335_s12 = scalar_lea.vmem %s457_s30, 128  ;;  %s386_s13 = smov [#allocation3]  }
  0x1c   : > { %p336_p11 = scmp.ne.s32.totalorder %s457_s30, %s335_s12  ;;  %s340_s14 = sshll.u32 %s386_s13, 4  ;;  %s341_s14 = int_to_ptr.vmem [resolvable:$false] %s340_s14 }
  0x1d   : > { %s342_s19 = scalar_lea.vmem %s341_s14, 256  ;;  %p343_p10 = scmp.lt.s32.totalorder %s457_s30, %s341_s14 }
  0x1e   : > { %p338_p13 = pnand %p336_p11, %p322_p12  ;;  %p344_p1 = scmp.lt.s32.totalorder %s342_s19, %s335_s12 }
  0x20   : > { %p339_p9 = pneg %p338_p13  ;;  %p345_p2 = por %p344_p1, %p343_p10 }
  0x22   : > { %p346_p3 = pnand %p345_p2, %p339_p9 }
  0x24   : > { %349 = shalt.err (!%p346_p3)
}
  0x25   : > { %286 = dma.hbm_to_vmem [thread:$0]  (!%p459_p8), %s455_s28, 128, %s457_s30, %s136_s5  }
  0x26   : > { %p526_p0 = scmp.lt.s32.totalorder %s384_s17, 3  ;;  %p527_p4 = scmp.ge.s32.totalorder %s384_s17, 1 }
  0x28   : > { %p152_p12 = pnand %p527_p4, %p526_p0 }
  0x29   : > { %s157_s20 = sand.u32 (!%p152_p12), 1, %s376_s15  }
  0x2a   : > { %155 = sbr.rel (%p152_p12) target bundleno = 200 (0xc8), region = 32  ;;  %s276_s23 = sshll.u32 (!%p152_p12), %s157_s20, 3 }
  0x2b   : > { %s158_s24 = scalar_lea.sflag (!%p152_p12), [#allocation4], %s157_s20  ;;  %s161_s25 = scalar_lea.vmem (!%p152_p12), [#allocation3], %s276_s23 }
  0x31   : > { %367 = dma.done.wait (%p446_p7), %s158_s24, 128  }
  0x32   : > { %369 = vsyncadd (%p446_p7), %s158_s24, 4294967168  ;;  %v187_v0 = vld [vmem:[%s161_s25] sm:$0xff]  ;;  %vm196_vm0 = vcmask 261120   ;;  %p183_p8 = scmp.lt.s32.totalorder %s429_s2, 1  ;;  %s200_s17 = sld [smem:[#allocation2]]  ;;  %vm203_vm1 = vcmask 7168  }
  0x33   : > { %v278_v1 = vld [vmem:[%s521_s1] ss:$0 sm:$0xff] }
  0x34   : > { %v195_v2 = vmul.f32 %v278_v1, %v187_v0  ;;  %s533_s2 = smov (!%p183_p8, %s429_s2), 1 }
  0x35   : > { %s277_s28 = sshll.u32 %s533_s2, 3 }
  0x36   : > { %v197_v3 = vsel %vm196_vm0, %v195_v2, 0.0  ;;  %s186_s22 = scalar_lea.vmem %s523_s3, %s277_s28 }
  0x37   : > { %198 = vadd.xlane.f32.xlu0 %v197_v3 }
  0x38   : > { %v201_v4 = vstv %s200_s17 }
  0xc4   : > { %v199_v5 = vpop.xlane.xlu0 %198 }
  0xc5   : > { %v202_v6 = vadd.f32 %v201_v4, %v199_v5 }
  0xc7   : > { %204 = vst.msk [vmem:[%s186_s22] sm:$0xff] %vm203_vm1, %v202_v6 }
  0xc8 PF: > { %p14_p7 = scmp.ge.s32.totalorder %s432_s18, 4   ;;  %s528_s14 = smov %s376_s15 }
  0xc9   : > { %s529_s15 = smov %s380_s16  ;;  %s530_s16 = smov %s442_s21 }
  0xca   : > { %s531_s17 = smov %s432_s18  ;;  %16 = sbr.rel (!%p14_p7) target bundleno = 5 (0x5), region = 72 }
  0xd1   :  { %224 = vsyncpa [#allocation4], 1 }
  0xd2   :  { %226 = vsyncpa [#allocation4 + $0x1], 1 }

</bundles_post_ra>
